<compile_context>
chip_gen: v7x
topology: tpu7x:2x2x1
jax: 0.10.0
libtpu: 0.0.40
codegen_flags: <defaults>
</compile_context>

<pallas_src>
import functools

import jax
import jax.numpy as jnp
from jax.experimental import pallas as pl
from jax.experimental.pallas import tpu as pltpu


# ---------------------------------------------------------------------------
# Block planning / shared helpers
# ---------------------------------------------------------------------------

_TARGET_BLOCK_BYTES = 4 * 1024 * 1024


def _plan_blocks(n_rows, row_bytes, target_bytes=_TARGET_BLOCK_BYTES):
    """Pick (rows_per_block, padded_rows, grid) for a (n_rows, L) lane-dense array.

    A legal block height is a multiple of 8 (sublane tile) or the full row
    extent.  Prefer an exact divisor of n_rows (no padding); otherwise pad the
    row axis with zero planes (zeros contribute nothing to any partial sum).
    """
    divisors = [t for t in range(1, n_rows + 1)
                if n_rows % t == 0 and (t % 8 == 0 or t == n_rows)]
    fitting = [t for t in divisors if t * row_bytes <= target_bytes]
    if fitting:
        t = max(fitting)
        return t, n_rows, n_rows // t
    # No fitting divisor: pad rows so a budget-sized multiple-of-8 block tiles it.
    t = max(8, (min(int(target_bytes // row_bytes), n_rows) // 8) * 8)
    padded = ((n_rows + t - 1) // t) * t
    return t, padded, padded // t


def _index_maps(h, w):
    """(1, H*W) float32 row/col index of each position of a flattened plane."""
    rr, cc = jnp.meshgrid(jnp.arange(h, dtype=jnp.float32),
                          jnp.arange(w, dtype=jnp.float32), indexing="ij")
    return rr.reshape(1, h * w), cc.reshape(1, h * w)


def _masked_pair_sum(x, row, col, shift, want_drow, want_dcol):
    """Sum of squared diffs between each element and its `shift`-lane partner.

    The row/col index maps are rotated by the same lane shift, so the
    valid-neighbour mask is derived from the *actual* pairing (robust to the
    rotation-direction convention); wrap-around and row-crossing pairs are
    rejected automatically.
    """
    xr = pltpu.roll(x, shift, axis=1)
    rr = pltpu.roll(row, shift, axis=1)
    cr = pltpu.roll(col, shift, axis=1)
    d = x - xr
    maskf = ((jnp.abs(rr - row) == want_drow)
             & (jnp.abs(cr - col) == want_dcol)).astype(jnp.float32)
    return jnp.sum(d * d * maskf)


def _tv_from_partials(h_tv, w_tv, b, c, h, w, tv_loss_weight):
    if h == 2:
        # With exactly two rows the cyclic pairing counts each vertical pair twice.
        h_tv = h_tv * 0.5
    # Same counts (and H==1 / W==1 division-by-zero behaviour) as PyTorch.
    count_h = c * (h - 1) * w
    count_w = c * h * (w - 1)
    return tv_loss_weight * 2.0 * (h_tv / count_h + w_tv / count_w) / b


# ---------------------------------------------------------------------------
# Kernels
# ---------------------------------------------------------------------------

def _tv_partial_kernel(x_ref, row_ref, col_ref, out_ref, *, width, flat_len):
    """Partial TV sums for one block of flattened planes.

    x_ref   : (TBC, L) block, L = H*W (each row is one flattened (H, W) plane).
    row_ref : (1, L) float32 -- row index (h) of each flattened position.
    col_ref : (1, L) float32 -- col index (w) of each flattened position.
    out_ref : (1, 2) SMEM    -- [sum sq vertical diffs, sum sq horizontal diffs].
    """
    x = x_ref[...].astype(jnp.float32)
    row = row_ref[...]
    col = col_ref[...]
    shift_h = (flat_len - width) % flat_len   # vertical neighbours: flat offset W
    shift_w = (flat_len - 1) % flat_len       # horizontal neighbours: flat offset 1
    out_ref[0, 0] = _masked_pair_sum(x, row, col, shift_h, 1.0, 0.0)
    out_ref[0, 1] = _masked_pair_sum(x, row, col, shift_w, 0.0, 1.0)


def _gen_partial_kernel(est_ref, img_ref, row_ref, col_ref, out_ref,
                        *, width, flat_len):
    """Fused per-block partials for GeneratorLoss: TV(h), TV(w), sum((est-img)^2)."""
    est = est_ref[...].astype(jnp.float32)
    img = img_ref[...].astype(jnp.float32)
    row = row_ref[...]
    col = col_ref[...]
    d_img = est - img
    shift_h = (flat_len - width) % flat_len
    shift_w = (flat_len - 1) % flat_len
    out_ref[0, 0] = _masked_pair_sum(est, row, col, shift_h, 1.0, 0.0)
    out_ref[0, 1] = _masked_pair_sum(est, row, col, shift_w, 0.0, 1.0)
    out_ref[0, 2] = jnp.sum(d_img * d_img)


def _sum_kernel(a_ref, out_ref):
    out_ref[0, 0] = jnp.sum(a_ref[...].astype(jnp.float32))


# ---------------------------------------------------------------------------
# TVLoss (standalone module)
# ---------------------------------------------------------------------------

def tv_loss(x, tv_loss_weight=1.0):
    """TV loss matching PyTorch TVLoss.forward.  x: (B, C, H, W)."""
    b, c, h, w = x.shape
    bc, hw = b * c, h * w

    x2d = x.reshape(bc, hw)                       # free reshape for NCHW
    row_map, col_map = _index_maps(h, w)

    itemsize = jnp.dtype(x.dtype).itemsize
    tbc, padded, g = _plan_blocks(bc, hw * itemsize)
    if padded != bc:
        x2d = jnp.pad(x2d, ((0, padded - bc), (0, 0)))

    block_bytes = tbc * hw * itemsize
    # TODO(synk): for planes so large that even 8 rows overflow VMEM, also tile
    # the H*W axis (with seam correction) so double-buffered blocks fit v7x.
    vmem_limit = int(min(max(2 * block_bytes + (8 << 20), 32 << 20), 64 << 20))

    kernel = functools.partial(_tv_partial_kernel, width=w, flat_len=hw)
    parts = pl.pallas_call(
        kernel,
        out_shape=jax.ShapeDtypeStruct((g, 2), jnp.float32),
        grid=(g,),
        in_specs=[
            pl.BlockSpec((tbc, hw), lambda i: (i, 0)),
            pl.BlockSpec((1, hw), lambda i: (0, 0)),
            pl.BlockSpec((1, hw), lambda i: (0, 0)),
        ],
        out_specs=pl.BlockSpec((1, 2), lambda i: (i, 0),
                               memory_space=pltpu.SMEM),
        compiler_params=pltpu.CompilerParams(
            dimension_semantics=("parallel",),
            vmem_limit_bytes=vmem_limit,
        ),
        cost_estimate=pl.CostEstimate(
            flops=8 * padded * hw,
            transcendentals=0,
            bytes_accessed=padded * hw * itemsize + 8 * hw + 8 * g,
        ),
    )(x2d, row_map, col_map)

    return _tv_from_partials(jnp.sum(parts[:, 0]), jnp.sum(parts[:, 1]),
                             b, c, h, w, tv_loss_weight)


# ---------------------------------------------------------------------------
# Small mean reduction (adversarial term)
# ---------------------------------------------------------------------------

def mean_value(a):
    n = a.size
    cols = 128
    rows = max(1, pl.cdiv(n, cols))
    a2 = jnp.pad(a.reshape(-1), (0, rows * cols - n)).reshape(rows, cols)
    s = pl.pallas_call(
        _sum_kernel,
        out_shape=jax.ShapeDtypeStruct((1, 1), jnp.float32),
        grid=(1,),
        in_specs=[pl.BlockSpec(a2.shape, lambda i: (0, 0))],
        out_specs=pl.BlockSpec((1, 1), lambda i: (0, 0),
                               memory_space=pltpu.SMEM),
    )(a2)
    return s[0, 0] / n


# ---------------------------------------------------------------------------
# GeneratorLoss forward (fused TV + image-MSE kernel)
# ---------------------------------------------------------------------------

def generator_loss(out_labels, hr_est, hr_img, idx=None):
    """GeneratorLoss.forward without the VGG16 perception term."""
    del idx  # unused, as in the PyTorch module
    b, c, h, w = hr_est.shape
    bc, hw = b * c, h * w

    est2d = hr_est.reshape(bc, hw)
    img2d = hr_img.reshape(bc, hw)
    row_map, col_map = _index_maps(h, w)

    item_est = jnp.dtype(hr_est.dtype).itemsize
    item_img = jnp.dtype(hr_img.dtype).itemsize
    tbc, padded, g = _plan_blocks(bc, hw * (item_est + item_img))
    if padded != bc:
        # Zero planes contribute 0 to both TV partials and to sum((est-img)^2).
        est2d = jnp.pad(est2d, ((0, padded - bc), (0, 0)))
        img2d = jnp.pad(img2d, ((0, padded - bc), (0, 0)))

    block_bytes = tbc * hw * (item_est + item_img)
    vmem_limit = int(min(max(2 * block_bytes + (8 << 20), 32 << 20), 64 << 20))

    kernel = functools.partial(_gen_partial_kernel, width=w, flat_len=hw)
    parts = pl.pallas_call(
        kernel,
        out_shape=jax.ShapeDtypeStruct((g, 3), jnp.float32),
        grid=(g,),
        in_specs=[
            pl.BlockSpec((tbc, hw), lambda i: (i, 0)),
            pl.BlockSpec((tbc, hw), lambda i: (i, 0)),
            pl.BlockSpec((1, hw), lambda i: (0, 0)),
            pl.BlockSpec((1, hw), lambda i: (0, 0)),
        ],
        out_specs=pl.BlockSpec((1, 3), lambda i: (i, 0),
                               memory_space=pltpu.SMEM),
        compiler_params=pltpu.CompilerParams(
            dimension_semantics=("parallel",),
            vmem_limit_bytes=vmem_limit,
        ),
        cost_estimate=pl.CostEstimate(
            flops=11 * padded * hw,
            transcendentals=0,
            bytes_accessed=padded * hw * (item_est + item_img) + 8 * hw + 12 * g,
        ),
    )(est2d, img2d, row_map, col_map)

    h_tv = jnp.sum(parts[:, 0])
    w_tv = jnp.sum(parts[:, 1])
    sq_sum = jnp.sum(parts[:, 2])

    tv = _tv_from_partials(h_tv, w_tv, b, c, h, w, 1.0)
    image_loss = sq_sum / hr_est.size
    adversarial = -mean_value(out_labels)
    # TODO(synk): perception_loss needs pretrained VGG16 features[:31]; those
    # weights are not available in-script, so that term is omitted here.
    return image_loss + 0.001 * adversarial + 2e-08 * tv


# ---------------------------------------------------------------------------
# Pure-JAX references
# ---------------------------------------------------------------------------

def _tv_loss_ref(x, tv_loss_weight=1.0):
    b, c, h, w = x.shape
    count_h = c * (h - 1) * w
    count_w = c * h * (w - 1)
    h_tv = jnp.sum(jnp.square(x[:, :, 1:, :] - x[:, :, :-1, :]))
    w_tv = jnp.sum(jnp.square(x[:, :, :, 1:] - x[:, :, :, :-1]))
    return tv_loss_weight * 2.0 * (h_tv / count_h + w_tv / count_w) / b


def _generator_loss_ref(out_labels, hr_est, hr_img):
    adversarial = -jnp.mean(out_labels)
    image_loss = jnp.mean(jnp.square(hr_est - hr_img))
    tv = _tv_loss_ref(hr_est)
    return image_loss + 0.001 * adversarial + 2e-08 * tv


if __name__ == "__main__":
    key = jax.random.PRNGKey(0)
    k1, k2, k3 = jax.random.split(key, 3)

    B, C, H, W = 2, 4, 16, 16
    hr_est = jax.random.normal(k1, (B, C, H, W), dtype=jnp.float32)
    hr_img = jax.random.normal(k2, (B, C, H, W), dtype=jnp.float32)
    out_labels = jax.random.uniform(k3, (B, 1), dtype=jnp.float32)

    tv = jax.block_until_ready(tv_loss(hr_est, tv_loss_weight=1.0))
    tv_ref = _tv_loss_ref(hr_est, tv_loss_weight=1.0)
    assert jnp.allclose(tv, tv_ref, rtol=5e-5, atol=5e-5), (tv, tv_ref)

    gen = jax.block_until_ready(generator_loss(out_labels, hr_est, hr_img, idx=0))
    gen_ref = _generator_loss_ref(out_labels, hr_est, hr_img)
    assert jnp.allclose(gen, gen_ref, rtol=5e-5, atol=5e-5), (gen, gen_ref)

    print("KERNEL_OK")
</pallas_src>

<mosaic_0001>
module attributes {stable_mosaic.version = 11 : i64} {
  func.func @_tv_partial_kernel(%arg0: i32, %arg1: memref<8x256xf32, #tpu.memory_space<vmem>>, %arg2: memref<1x256xf32, #tpu.memory_space<vmem>>, %arg3: memref<1x256xf32, #tpu.memory_space<vmem>>, %arg4: memref<1x2xf32, #tpu.memory_space<smem>>) attributes {dimension_semantics = [#tpu.dimension_semantics<parallel>], iteration_bounds = array<i64: 1>, scalar_prefetch = 0 : i64, scratch_operands = 0 : i64, tpu.core_type = #tpu.core_type<tc>, window_params = [{transform_indices = @transform_0, window_bounds = array<i64: 8, 256>}, {pipeline_mode = #tpu.pipeline_mode<synchronous>, transform_indices = @transform_1, window_bounds = array<i64: 1, 256>}, {pipeline_mode = #tpu.pipeline_mode<synchronous>, transform_indices = @transform_2, window_bounds = array<i64: 1, 256>}, {transform_indices = @transform_3, window_bounds = array<i64: 1, 2>}]} {
    %c0 = arith.constant 0 : index
    %c0_0 = arith.constant 0 : index
    %0 = vector.load %arg1[%c0, %c0_0] : memref<8x256xf32, #tpu.memory_space<vmem>>, vector<8x256xf32>
    %c0_1 = arith.constant 0 : index
    %c0_2 = arith.constant 0 : index
    %1 = vector.load %arg2[%c0_1, %c0_2] : memref<1x256xf32, #tpu.memory_space<vmem>>, vector<1x256xf32>
    %c0_3 = arith.constant 0 : index
    %c0_4 = arith.constant 0 : index
    %2 = vector.load %arg3[%c0_3, %c0_4] : memref<1x256xf32, #tpu.memory_space<vmem>>, vector<1x256xf32>
    %c240_i32 = arith.constant 240 : i32
    %3 = tpu.dynamic_rotate %0 by %c240_i32 dim 1 : vector<8x256xf32>, i32 -> vector<8x256xf32>
    %c240_i32_5 = arith.constant 240 : i32
    %4 = tpu.dynamic_rotate %1 by %c240_i32_5 dim 1 : vector<1x256xf32>, i32 -> vector<1x256xf32>
    %c240_i32_6 = arith.constant 240 : i32
    %5 = tpu.dynamic_rotate %2 by %c240_i32_6 dim 1 : vector<1x256xf32>, i32 -> vector<1x256xf32>
    %6 = arith.subf %0, %3 : vector<8x256xf32>
    %7 = arith.subf %4, %1 : vector<1x256xf32>
    %8 = math.absf %7 : vector<1x256xf32>
    %cst = arith.constant 1.000000e+00 : f32
    %9 = vector.broadcast %cst : f32 to vector<1x256xf32>
    %10 = arith.cmpf oeq, %8, %9 : vector<1x256xf32>
    %11 = arith.subf %5, %2 : vector<1x256xf32>
    %12 = math.absf %11 : vector<1x256xf32>
    %cst_7 = arith.constant 0.000000e+00 : f32
    %13 = vector.broadcast %cst_7 : f32 to vector<1x256xf32>
    %14 = arith.cmpf oeq, %12, %13 : vector<1x256xf32>
    %15 = arith.andi %10, %14 : vector<1x256xi1>
    %16 = arith.extui %15 : vector<1x256xi1> to vector<1x256xi32>
    %17 = arith.sitofp %16 : vector<1x256xi32> to vector<1x256xf32>
    %18 = arith.mulf %6, %6 : vector<8x256xf32>
    %19 = vector.broadcast %17 : vector<1x256xf32> to vector<8x256xf32>
    %20 = arith.mulf %18, %19 : vector<8x256xf32>
    %21 = vector.shape_cast %20 : vector<8x256xf32> to vector<1x8x256xf32>
    %cst_8 = arith.constant dense<0.000000e+00> : vector<1xf32>
    %22 = vector.multi_reduction <add>, %21, %cst_8 [1, 2] : vector<1x8x256xf32> to vector<1xf32>
    %23 = vector.shape_cast %22 : vector<1xf32> to vector<1x1x1xf32>
    %24 = vector.extract %23[0, 0, 0] : f32 from vector<1x1x1xf32>
    %c0_9 = arith.constant 0 : index
    %c0_10 = arith.constant 0 : index
    %25 = memref.load %arg4[%c0_9, %c0_10] : memref<1x2xf32, #tpu.memory_space<smem>>
    memref.store %24, %arg4[%c0_9, %c0_10] : memref<1x2xf32, #tpu.memory_space<smem>>
    %c255_i32 = arith.constant 255 : i32
    %26 = tpu.dynamic_rotate %0 by %c255_i32 dim 1 : vector<8x256xf32>, i32 -> vector<8x256xf32>
    %c255_i32_11 = arith.constant 255 : i32
    %27 = tpu.dynamic_rotate %1 by %c255_i32_11 dim 1 : vector<1x256xf32>, i32 -> vector<1x256xf32>
    %c255_i32_12 = arith.constant 255 : i32
    %28 = tpu.dynamic_rotate %2 by %c255_i32_12 dim 1 : vector<1x256xf32>, i32 -> vector<1x256xf32>
    %29 = arith.subf %0, %26 : vector<8x256xf32>
    %30 = arith.subf %27, %1 : vector<1x256xf32>
    %31 = math.absf %30 : vector<1x256xf32>
    %cst_13 = arith.constant 0.000000e+00 : f32
    %32 = vector.broadcast %cst_13 : f32 to vector<1x256xf32>
    %33 = arith.cmpf oeq, %31, %32 : vector<1x256xf32>
    %34 = arith.subf %28, %2 : vector<1x256xf32>
    %35 = math.absf %34 : vector<1x256xf32>
    %cst_14 = arith.constant 1.000000e+00 : f32
    %36 = vector.broadcast %cst_14 : f32 to vector<1x256xf32>
    %37 = arith.cmpf oeq, %35, %36 : vector<1x256xf32>
    %38 = arith.andi %33, %37 : vector<1x256xi1>
    %39 = arith.extui %38 : vector<1x256xi1> to vector<1x256xi32>
    %40 = arith.sitofp %39 : vector<1x256xi32> to vector<1x256xf32>
    %41 = arith.mulf %29, %29 : vector<8x256xf32>
    %42 = vector.broadcast %40 : vector<1x256xf32> to vector<8x256xf32>
    %43 = arith.mulf %41, %42 : vector<8x256xf32>
    %44 = vector.shape_cast %43 : vector<8x256xf32> to vector<1x8x256xf32>
    %cst_15 = arith.constant dense<0.000000e+00> : vector<1xf32>
    %45 = vector.multi_reduction <add>, %44, %cst_15 [1, 2] : vector<1x8x256xf32> to vector<1xf32>
    %46 = vector.shape_cast %45 : vector<1xf32> to vector<1x1x1xf32>
    %47 = vector.extract %46[0, 0, 0] : f32 from vector<1x1x1xf32>
    %c0_16 = arith.constant 0 : index
    %c1 = arith.constant 1 : index
    %48 = memref.load %arg4[%c0_16, %c1] : memref<1x2xf32, #tpu.memory_space<smem>>
    memref.store %47, %arg4[%c0_16, %c1] : memref<1x2xf32, #tpu.memory_space<smem>>
    return
  }
  func.func @transform_0(%arg0: i32) -> (i32, i32) {
    %c0_i32 = arith.constant 0 : i32
    %c0_i32_0 = arith.constant 0 : i32
    return %arg0, %c0_i32 : i32, i32
  }
  func.func @transform_1(%arg0: i32) -> (i32, i32) {
    %c0_i32 = arith.constant 0 : i32
    %c0_i32_0 = arith.constant 0 : i32
    %c0_i32_1 = arith.constant 0 : i32
    return %c0_i32, %c0_i32_0 : i32, i32
  }
  func.func @transform_2(%arg0: i32) -> (i32, i32) {
    %c0_i32 = arith.constant 0 : i32
    %c0_i32_0 = arith.constant 0 : i32
    %c0_i32_1 = arith.constant 0 : i32
    return %c0_i32, %c0_i32_0 : i32, i32
  }
  func.func @transform_3(%arg0: i32) -> (i32, i32) {
    %c0_i32 = arith.constant 0 : i32
    %c0_i32_0 = arith.constant 0 : i32
    return %arg0, %c0_i32 : i32, i32
  }
}

</mosaic_0001>

<bundles_post_ra>
// kernel: tpu_custom_call.1
= control target key start
LH: loop header
LB: loop body
LE: loop exit
PB: predicated region body
PF: predicated region fallthrough
CT: control target
= control target key end

     0   :  { %8 = vsyncpa [#allocation3], 0  ;;  %s347_s0 = inlined_call_operand.hbm [shape: f32[8,256], index: 0, kind: input, shape index: {}]   ;;  %s348_s1 = inlined_call_operand.vmem [shape: f32[1,256], index: 1, kind: input, shape index: {}]   ;;  %s349_s2 = inlined_call_operand.vmem [shape: f32[1,256], index: 2, kind: input, shape index: {}]   ;;  %s350_s3 = inlined_call_operand.hbm [shape: f32[1,2], index: 3, kind: output, shape index: {}]  }
   0x1   :  { %9 = vsyncpa [#allocation4], 0  ;;  %s244_s12 = smov [#allocation2]   ;;  %s208_s16 = scalar_lea.hbm %s347_s0, 256 }
   0x2   :  { %s16_s13 = sshll.u32 %s244_s12, 4  ;;  %p209_p0 = scmp.ne.s32.totalorder %s347_s0, %s208_s16  ;;  %s17_s13 = int_to_ptr.vmem [resolvable:$true] %s16_s13 }
   0x3   :  { %p212_p1 = scmp.lt.u32.totalorder %s208_s16, %s347_s0 }
   0x5   :  { %p214_p2 = pnand %p212_p1, %p209_p0 }
   0x7   :  { %217 = shalt.err (!%p214_p2)
}
   0x8   :  { %s218_s21 = scalar_lea.vmem %s17_s13, 256  ;;  %p223_p4 = scmp.lt.s32.totalorder %s17_s13, %s17_s13 }
   0x9   :  { %p219_p3 = scmp.ne.s32.totalorder %s17_s13, %s218_s21  ;;  %p224_p5 = scmp.lt.s32.totalorder %s218_s21, %s218_s21 }
   0xb   :  { %p225_p6 = por %p224_p5, %p223_p4 }
   0xd   :  { %p226_p7 = pnand %p225_p6, %p219_p3 }
   0xf   :  { %229 = shalt.err (!%p226_p7)
}
  0x10   :  { %19 = dma.hbm_to_vmem [thread:$0]  %s347_s0, 256, %s17_s13, [#allocation3]  }
  0x11   :  { %240 = dma.done.wait [#allocation3], 256  }
  0x12   :  { %241 = vsyncadd [#allocation3], 4294967040  ;;  %v35_v0 = vlaneseq  ;;  %v30_v4 = vld [vmem:[%s349_s2] sm:$0x3]  ;;  %s245_s0 = smov 112   ;;  %s246_s28 = smov 127  }
  0x13   :  { %v29_v5 = vld [vmem:[%s348_s1] sm:$0x3]  ;;  %v291_v10 = vld [vmem:[#allocation2 + $0x8] sm:$0xff]  ;;  %v247_v43 = vmov 0.0   ;;  %s230_s4 = scalar_lea.hbm %s350_s3, 16 }
  0x14   :  { %v42_v1 = vshrl.u32 %v35_v0, 7  ;;  %v293_v11 = vld [vmem:[#allocation2] sm:$0xff]  ;;  %v299_v12 = vand.u32 127, %v35_v0  ;;  %p231_p8 = scmp.ne.s32.totalorder %s350_s3, %s230_s4  ;;  %p234_p9 = scmp.lt.u32.totalorder %s230_s4, %s350_s3 }
  0x16   :  { %v281_v2 = vsub.s32 0, %v42_v1  ;;  %v47_v3 = vsub.s32 1, %v42_v1  ;;  %vm37_vm0 = vcmp.lt.s32.totalorder %v299_v12, 112  ;;  %vm122_vm1 = vcmp.lt.s32.totalorder %v299_v12, 127  ;;  %p236_p10 = pnand %p234_p9, %p231_p8 }
  0x18   :  { %v61_v6 = vrot.slane %v30_v4, %v281_v2  ;;  %v44_v7 = vrot.slane %v29_v5, %v281_v2  ;;  %v65_v8 = vrot.slane %v30_v4, %v47_v3  ;;  %v48_v9 = vrot.slane %v29_v5, %v47_v3 }
  0x1a   :  { %68 = vrot.lane.b32.xlu1 %v61_v6, %s245_s0  ;;  %51 = vrot.lane.b32.xlu0 %v44_v7, %s245_s0 }
  0x1e   :  { %70 = vrot.lane.b32.xlu1 %v65_v8, %s245_s0  ;;  %53 = vrot.lane.b32.xlu0 %v48_v9, %s245_s0 }
  0x22   :  { %127 = vrot.lane.b32.xlu1 %v48_v9, %s246_s28  ;;  %125 = vrot.lane.b32.xlu0 %v44_v7, %s246_s28 }
  0x26   :  { %133 = vrot.lane.b32.xlu1 %v65_v8, %s246_s28  ;;  %131 = vrot.lane.b32.xlu0 %v61_v6, %s246_s28 }
  0x2a   :  { %33 = vrot.lane.b32.xlu1 %v291_v10, %s245_s0  ;;  %31 = vrot.lane.b32.xlu0 %v293_v11, %s245_s0 }
  0x2e   :  { %120 = vrot.lane.b32.xlu1 %v291_v10, %s246_s28  ;;  %118 = vrot.lane.b32.xlu0 %v293_v11, %s246_s28 }
  0x8c   :  { %v69_v13 = vpop.permute.xlu1 %68  ;;  %v52_v14 = vpop.permute.xlu0 %51 }
  0x90   :  { %v71_v15 = vpop.permute.xlu1 %70  ;;  %v54_v16 = vpop.permute.xlu0 %53 }
  0x91   :  { %v72_v17 = vsel %vm37_vm0, %v69_v13, %v71_v15  ;;  %v73_v18 = vsel %vm37_vm0, %v71_v15, %v69_v13  ;;  %v55_v19 = vsel %vm37_vm0, %v52_v14, %v54_v16  ;;  %v56_v20 = vsel %vm37_vm0, %v54_v16, %v52_v14 }
  0x92   :  { %v82_v21 = vsub.f32 %v72_v17, %v61_v6  ;;  %v83_v22 = vsub.f32 %v73_v18, %v65_v8  ;;  %v76_v23 = vsub.f32 %v55_v19, %v44_v7  ;;  %v77_v24 = vsub.f32 %v56_v20, %v48_v9 }
  0x94   :  { %v84_v25 = vand.u32 2147483647, %v82_v21  ;;  %v85_v26 = vand.u32 2147483647, %v83_v22  ;;  %v78_v27 = vand.u32 2147483647, %v76_v23  ;;  %v128_v28 = vpop.permute.xlu1 %127  ;;  %v126_v29 = vpop.permute.xlu0 %125 }
  0x95   :  { %v79_v30 = vand.u32 2147483647, %v77_v24  ;;  %v129_v31 = vsel %vm122_vm1, %v126_v29, %v128_v28  ;;  %v130_v32 = vsel %vm122_vm1, %v128_v28, %v126_v29 }
  0x96   :  { %vm86_vm2 = vcmp.eq.f32.partialorder %v84_v25, 0.0  ;;  %vm80_vm3 = vcmp.eq.f32.partialorder %v78_v27, 1.0  ;;  %v139_v33 = vsub.f32 %v129_v31, %v44_v7  ;;  %vm87_vm4 = vcmp.eq.f32.partialorder %v85_v26, 0.0 }
  0x97   :  { %vm81_vm5 = vcmp.eq.f32.partialorder %v79_v30, 1.0  ;;  %v140_v34 = vsub.f32 %v130_v32, %v48_v9  ;;  %vm88_vm6 = vmand %vm80_vm3, %vm86_vm2 }
  0x98   :  { %v134_v35 = vpop.permute.xlu1 %133  ;;  %v132_v36 = vpop.permute.xlu0 %131  ;;  %v141_v37 = vand.u32 2147483647, %v139_v33  ;;  %vm89_vm7 = vmand %vm81_vm5, %vm87_vm4  ;;  %v195_v44 = vsel %vm88_vm6, 1.0, %v247_v43 }
  0x99   :  { %v135_v38 = vsel %vm122_vm1, %v132_v36, %v134_v35  ;;  %v136_v39 = vsel %vm122_vm1, %v134_v35, %v132_v36  ;;  %v142_v42 = vand.u32 2147483647, %v140_v34  ;;  %v196_v49 = vsel %vm89_vm7, 1.0, %v247_v43 }
  0x9a   :  { %v145_v40 = vsub.f32 %v135_v38, %v61_v6  ;;  %v146_v41 = vsub.f32 %v136_v39, %v65_v8  ;;  %vm143_vm8 = vcmp.eq.f32.partialorder %v141_v37, 0.0  ;;  %v99_v54 = vrot.slane %v195_v44, %v281_v2 }
  0x9b   :  { %vm144_vm11 = vcmp.eq.f32.partialorder %v142_v42, 0.0  ;;  %v103_v60 = vrot.slane %v196_v49, %v281_v2 }
  0x9c   :  { %v147_v45 = vand.u32 2147483647, %v145_v40  ;;  %v148_v46 = vand.u32 2147483647, %v146_v41  ;;  %v34_v47 = vpop.permute.xlu1 %33  ;;  %v32_v48 = vpop.permute.xlu0 %31 }
  0x9d   :  { %v38_v50 = vsel %vm37_vm0, %v32_v48, %v34_v47  ;;  %v39_v51 = vsel %vm37_vm0, %v34_v47, %v32_v48 }
  0x9e   :  { %vm149_vm9 = vcmp.eq.f32.partialorder %v147_v45, 1.0  ;;  %vm150_vm10 = vcmp.eq.f32.partialorder %v148_v46, 1.0  ;;  %v74_v52 = vsub.f32 %v293_v11, %v38_v50  ;;  %v75_v53 = vsub.f32 %v291_v10, %v39_v51 }
  0x9f   :  { %vm151_vm12 = vmand %vm143_vm8, %vm149_vm9 }
  0xa0   :  { %vm152_vm13 = vmand %vm144_vm11, %vm150_vm10  ;;  %v197_v55 = vsel %vm151_vm12, 1.0, %v247_v43  ;;  %v94_v56 = vmul.f32 %v74_v52, %v74_v52  ;;  %v95_v57 = vmul.f32 %v75_v53, %v75_v53  ;;  %v121_v58 = vpop.permute.xlu1 %120  ;;  %v119_v59 = vpop.permute.xlu0 %118 }
  0xa1   :  { %v198_v61 = vsel %vm152_vm13, 1.0, %v247_v43  ;;  %v123_v62 = vsel %vm122_vm1, %v119_v59, %v121_v58  ;;  %v124_v63 = vsel %vm122_vm1, %v121_v58, %v119_v59  ;;  %v162_v5 = vrot.slane %v197_v55, %v281_v2 }
  0xa2   :  { %v137_v0 = vsub.f32 %v293_v11, %v123_v62  ;;  %v138_v1 = vsub.f32 %v291_v10, %v124_v63  ;;  %v104_v3 = vmul.f32 %v99_v54, %v94_v56  ;;  %v105_v4 = vmul.f32 %v103_v60, %v95_v57 }
  0xa3   :  { %v166_v9 = vrot.slane %v198_v61, %v281_v2 }
  0xa4   :  { %v157_v6 = vmul.f32 %v137_v0, %v137_v0  ;;  %v158_v7 = vmul.f32 %v138_v1, %v138_v1  ;;  %v106_v8 = vadd.f32 %v105_v4, %v104_v3 }
  0xa6   :  { %107 = vadd.xlane.f32.xlu0 %v106_v8  ;;  %v167_v13 = vmul.f32 %v162_v5, %v157_v6  ;;  %v168_v14 = vmul.f32 %v166_v9, %v158_v7 }
  0xa8   :  { %v169_v15 = vadd.f32 %v168_v14, %v167_v13 }
  0xaa   :  { %170 = vadd.xlane.f32.xlu1 %v169_v15 }
 0x133   :  { %v108_v12 = vpop.xlane.xlu0 %107 }
 0x134   :  { %v109_v16 = vrot.slane %v108_v12, 4 }
 0x136   :  { %v110_v17 = vadd.f32 %v109_v16, %v108_v12 }
 0x137   :  { %v171_v11 = vpop.xlane.xlu1 %170 }
 0x138   :  { %v111_v18 = vrot.slane %v110_v17, 2  ;;  %v172_v10 = vrot.slane %v171_v11, 4 }
 0x13a   :  { %v173_v19 = vadd.f32 %v172_v10, %v171_v11  ;;  %v112_v20 = vadd.f32 %v111_v18, %v110_v17 }
 0x13c   :  { %v174_v21 = vrot.slane %v173_v19, 2  ;;  %v113_v22 = vrot.slane %v112_v20, 1 }
 0x13e   :  { %v175_v23 = vadd.f32 %v174_v21, %v173_v19  ;;  %v114_v24 = vadd.f32 %v113_v22, %v112_v20 }
 0x140   :  { %199 = vpush %v114_v24  ;;  %v176_v25 = vrot.slane %v175_v23, 1 }
 0x142   :  { %v177_v2 = vadd.f32 %v176_v25, %v175_v23 }
 0x144   :  { %201 = vpush %v177_v2 }
 0x171   :  { %s200_s1 = spop %199 }
 0x172   :  { %117 = sst [smem:[#allocation5]] %s200_s1 }
 0x175   :  { %s202_s2 = spop %201 }
 0x176   :  { %180 = sst [smem:[#allocation5 + $0x1]] %s202_s2 }
 0x177   :  { %239 = shalt.err (!%p236_p10)
}
 0x178   :  { %s248_s9 = smov [#allocation5]  }
 0x179   :  { %188 = dma.smem_to_hbm %s248_s9, 16, %s350_s3, [#allocation4]  }
 0x17a   :  { %242 = dma.done.wait [#allocation4], 16  }
 0x17b   :  { %243 = vsyncadd [#allocation4], 4294967280 }
 0x17c   :  { %192 = sfence }
 0x17d   :  { %193 = vsyncpa [#allocation3], 1 }
 0x17e   :  { %194 = vsyncpa [#allocation4], 1 }

</bundles_post_ra>
